<compile_context>
chip_gen: v7x
topology: tpu7x:2x2x1
jax: 0.10.0
libtpu: 0.0.40
codegen_flags: <defaults>
</compile_context>

<pallas_src>
import functools

import jax
import jax.numpy as jnp
from jax.experimental import pallas as pl
from jax.experimental.pallas import tpu as pltpu


def _pick_tile(n, cap, base=8):
    """Largest tile <= cap that divides n and is a multiple of `base` (else n)."""
    if n <= cap:
        return n
    t = (cap // base) * base
    while t >= base:
        if n % t == 0:
            return t
        t -= base
    return n


def _vmem_limit_bytes():
    """Generation-aware VMEM budget: ~48 MiB on v7x (64 MiB), ~96 MiB on 128 MiB parts."""
    cap = None
    try:
        info = pltpu.get_tpu_info()
        cap = getattr(info, "vmem_capacity_bytes", None)
    except Exception:
        cap = None
    if not cap:
        cap = 64 * 1024 * 1024            # conservative fallback (v7x-sized)
    return int(min(cap * 3 // 4, 100 * 1024 * 1024))


def _dst_tile(N, H, D, with_att, vmem_limit):
    """Pick the dst tile size from the VMEM budget instead of a fixed constant."""
    HD = H * D
    fixed = 2 * (N * HD * 2) + 2 * (H * N * 4)      # resident feat bf16 + elT f32
    per_tv = 2 * N                                   # adj int8 tile (double-buffered)
    per_tv += 2 * H * 4 + 2 * HD * 4                 # er in + node-out slab
    if with_att:
        per_tv += 2 * H * N * 2                      # bf16 attention tile
    per_tv += 6 * N * 4                              # f32 (tv, N) in-kernel temporaries
    budget = int(vmem_limit * 0.9) - fixed
    cap = max(32, budget // per_tv) if budget > 0 else 32
    cap = int(min(cap, 1024))
    # int8 adjacency tile: second-to-last block dim must be a multiple of 32
    # (unless it equals the full array dim, which _pick_tile also allows).
    return _pick_tile(N, cap, base=32)


# ----------------------------------------------------------------------------
# Kernel 1: feat = h @ W  (bf16 out) plus el/er attention-logit epilogue
# ----------------------------------------------------------------------------
def _project_kernel(h_ref, w_ref, a_ref, feat_ref, ler_ref):
    acc = jnp.dot(h_ref[...], w_ref[...],
                  preferred_element_type=jnp.float32)          # (tm, H*D) f32
    feat_ref[...] = acc.astype(jnp.bfloat16)
    # ler[:, :H] = el, ler[:, H:] = er  via one block-structured matmul.
    ler_ref[...] = jnp.dot(acc, a_ref[...],
                           preferred_element_type=jnp.float32)  # (tm, 2H)


def project(h, W, a_comb, *, row_tile=4096):
    N, Fin = h.shape
    HD = W.shape[1]
    H2 = a_comb.shape[1]
    tm = _pick_tile(N, row_tile, base=16)   # bf16 blocks need sublane multiple of 16
    return pl.pallas_call(
        _project_kernel,
        grid=(N // tm,),
        in_specs=[
            pl.BlockSpec((tm, Fin), lambda i: (i, 0)),
            pl.BlockSpec((Fin, HD), lambda i: (0, 0)),
            pl.BlockSpec((HD, H2), lambda i: (0, 0)),
        ],
        out_specs=(
            pl.BlockSpec((tm, HD), lambda i: (i, 0)),
            pl.BlockSpec((tm, H2), lambda i: (i, 0)),
        ),
        out_shape=(
            jax.ShapeDtypeStruct((N, HD), jnp.bfloat16),
            jax.ShapeDtypeStruct((N, H2), jnp.float32),
        ),
        compiler_params=pltpu.CompilerParams(
            dimension_semantics=("parallel",)),
    )(h.astype(jnp.bfloat16), W.astype(jnp.bfloat16), a_comb.astype(jnp.float32))


# ----------------------------------------------------------------------------
# Kernel 2: per-dst-tile edge-softmax attention + aggregation
# ----------------------------------------------------------------------------
def _gat_attn_kernel(elT_ref, er_ref, adjt_ref, feat_ref, out_ref, *att_refs,
                     num_heads, out_feats, negative_slope, apply_elu):
    adj = adjt_ref[...]                                   # (TV, N) int8 mask
    elT = elT_ref[...]                                    # (H, N) f32
    er = er_ref[...]                                      # (TV, H) f32
    feat = feat_ref[...]                                  # (N, H*D) bf16

    # One additive mask bias shared by all heads (replaces per-head selects).
    bias = jnp.where(adj != 0, jnp.float32(0.0), jnp.float32(-1e30))  # (TV, N)
    ns = jnp.float32(negative_slope)

    heads_out = []
    for hd in range(num_heads):
        e = er[:, hd:hd + 1] + elT[hd:hd + 1, :]          # (TV, N): er[v] + el[u]
        e = jnp.where(e >= 0, e, ns * e)                  # LeakyReLU
        e = e + bias                                      # mask non-edges
        m = jnp.max(e, axis=1, keepdims=True)             # (TV, 1), finite (self-loop)
        p = jnp.exp(e - m)                                # masked entries underflow to 0
        denom = jnp.sum(p, axis=1, keepdims=True)
        a = p * pl.reciprocal(denom, approx=True)         # edge softmax over incoming
        if att_refs:
            att_refs[0][hd] = a.astype(att_refs[0].dtype)  # per-head bf16 store
        f_h = feat[:, hd * out_feats:(hd + 1) * out_feats]  # (N, D) bf16
        r = jnp.dot(a.astype(jnp.bfloat16), f_h,
                    preferred_element_type=jnp.float32)    # (TV, D) aggregation
        if apply_elu:
            r = jnp.where(r > 0, r, jnp.exp(jnp.minimum(r, 0.0)) - 1.0)
        heads_out.append(r)

    # Single (TV, H*D) store for the node output slab.
    # TODO(synk): H*D < 128 lanes -> masked stores; a transposed layout would be
    # lane-dense but the wrapper-side transpose back would cost the same traffic.
    out_ref[...] = jnp.concatenate(heads_out, axis=1)


def _attn_block_matrix(a):
    """(H, D) attention vector -> (H*D, H) block-structured column matrix."""
    H, D = a.shape
    eye = jnp.eye(H, dtype=a.dtype)
    return (eye[:, None, :] * a[:, :, None]).reshape(H * D, H)


def gat_conv(h, W, attn_l, attn_r, adj_i8, *, negative_slope=0.2,
             apply_elu=False, return_attention=False):
    """One GATConv layer.

    Returns (node features (N, H*D) f32, attention (H, N, N) bf16 or None).
    The attention output is only materialized when return_attention=True.
    """
    N = h.shape[0]
    H, D = attn_l.shape
    HD = H * D

    a_comb = jnp.concatenate(
        [_attn_block_matrix(attn_l), _attn_block_matrix(attn_r)], axis=1)  # (HD, 2H)
    feat_bf, ler = project(h, W, a_comb)        # (N, HD) bf16, (N, 2H) f32
    elT = ler[:, :H].T                          # (H, N) f32 (tiny XLA transpose)
    er = ler[:, H:]                             # (N, H) f32

    vmem_limit = _vmem_limit_bytes()
    tv = _dst_tile(N, H, D, return_attention, vmem_limit)

    kernel = functools.partial(_gat_attn_kernel, num_heads=H, out_feats=D,
                               negative_slope=negative_slope,
                               apply_elu=apply_elu)

    in_specs = [
        pl.BlockSpec((H, N), lambda i: (0, 0)),     # elT: resident
        pl.BlockSpec((tv, H), lambda i: (i, 0)),    # er: dst tile
        pl.BlockSpec((tv, N), lambda i: (i, 0)),    # adj_t tile (int8, dst-major)
        pl.BlockSpec((N, HD), lambda i: (0, 0)),    # feat: all source nodes (bf16)
    ]
    out_spec_nodes = pl.BlockSpec((tv, HD), lambda i: (i, 0))
    if return_attention:
        out_specs = (out_spec_nodes,
                     pl.BlockSpec((H, tv, N), lambda i: (0, i, 0)))
        out_shape = (jax.ShapeDtypeStruct((N, HD), jnp.float32),
                     jax.ShapeDtypeStruct((H, N, N), jnp.bfloat16))
    else:
        out_specs = out_spec_nodes
        out_shape = jax.ShapeDtypeStruct((N, HD), jnp.float32)

    result = pl.pallas_call(
        kernel,
        grid=(N // tv,),
        in_specs=in_specs,
        out_specs=out_specs,
        out_shape=out_shape,
        compiler_params=pltpu.CompilerParams(
            dimension_semantics=("parallel",),        # megacore split on v7x
            vmem_limit_bytes=vmem_limit),
    )(elT, er, adj_i8, feat_bf)

    if return_attention:
        out, att = result
        return out, att
    return result, None


def init_gat_params(key, num_layers, in_dim, num_hidden, num_classes, heads):
    """Deterministic xavier-normal-style init (gain = sqrt(2), as for 'relu')."""
    gain = 2.0 ** 0.5
    dims_in = ([in_dim]
               + [num_hidden * heads[l - 1] for l in range(1, num_layers)]
               + [num_hidden * heads[num_layers - 1]])
    dims_out = [num_hidden] * num_layers + [num_classes]
    params = []
    for l in range(num_layers + 1):
        fin, fout, H = dims_in[l], dims_out[l], heads[l]
        key, kw, kl, kr = jax.random.split(key, 4)
        std_w = gain * (2.0 / (fin + H * fout)) ** 0.5
        W = std_w * jax.random.normal(kw, (fin, H * fout), dtype=jnp.float32)
        std_a = gain * (2.0 / (H * fout + fout)) ** 0.5
        al = std_a * jax.random.normal(kl, (H, fout), dtype=jnp.float32)
        ar = std_a * jax.random.normal(kr, (H, fout), dtype=jnp.float32)
        params.append((W, al, ar))
    return params


def gat_forward(params, x, adj_t, num_layers, negative_slope=0.2):
    """Mirrors GAT.forward: returns (logits, att, middle, penultimate_layer)."""
    adj_i8 = (adj_t != 0).astype(jnp.int8)   # 0/1 mask; halves the N^2 HBM read
    h = x
    middle = []
    for l in range(num_layers):
        W, al, ar = params[l]
        # Hidden layers: skip the dense (H, N, N) attention writeback entirely.
        h, _ = gat_conv(h, W, al, ar, adj_i8, negative_slope=negative_slope,
                        apply_elu=True, return_attention=False)
        middle.append(h)                      # already flattened to (N, H*D)
    W, al, ar = params[-1]
    out, att = gat_conv(h, W, al, ar, adj_i8, negative_slope=negative_slope,
                        apply_elu=False, return_attention=True)
    H, D = al.shape
    logits = out.reshape(out.shape[0], H, D).mean(axis=1)     # mean over heads
    middle.append(logits)
    penultimate_layer = middle[-2]
    return logits, att, middle, penultimate_layer


if __name__ == "__main__":
    # small config: 512 nodes, 2 hidden GAT layers + 1 output layer
    N = 512
    num_layers = 2
    in_dim = 32
    num_hidden = 16
    num_classes = 8
    heads = [2, 2, 1]

    key = jax.random.PRNGKey(0)
    k_adj, k_x, k_params = jax.random.split(key, 3)

    # deterministic random graph (dense adjacency) with self-loops
    adj = (jax.random.uniform(k_adj, (N, N)) < 0.05).astype(jnp.float32)  # adj[u, v]: u->v
    adj = jnp.maximum(adj, jnp.eye(N, dtype=jnp.float32))                 # no zero in-degree
    adj_t = adj.T                                                         # adj_t[v, u]

    x = jax.random.normal(k_x, (N, in_dim), dtype=jnp.float32)
    params = init_gat_params(k_params, num_layers, in_dim, num_hidden,
                             num_classes, heads)

    logits, att, middle, penult = gat_forward(params, x, adj_t, num_layers)
    jax.block_until_ready((logits, att, middle, penult))

    assert logits.shape == (N, num_classes)
    assert att.shape == (heads[-1], N, N)
    assert penult.shape == (N, num_hidden * heads[num_layers - 1])
    assert bool(jnp.all(jnp.isfinite(logits)))
    assert bool(jnp.all(jnp.isfinite(att.astype(jnp.float32))))
    print("KERNEL_OK")
</pallas_src>

<mosaic_0001>
module attributes {stable_mosaic.version = 11 : i64} {
  func.func @_project_kernel(%arg0: i32, %arg1: memref<512x32xbf16, #tpu.memory_space<vmem>>, %arg2: memref<32x32xbf16, #tpu.memory_space<vmem>>, %arg3: memref<32x4xf32, #tpu.memory_space<vmem>>, %arg4: memref<512x32xbf16, #tpu.memory_space<vmem>>, %arg5: memref<512x4xf32, #tpu.memory_space<vmem>>) attributes {dimension_semantics = [#tpu.dimension_semantics<parallel>], iteration_bounds = array<i64: 1>, scalar_prefetch = 0 : i64, scratch_operands = 0 : i64, tpu.core_type = #tpu.core_type<tc>, window_params = [{transform_indices = @transform_0, window_bounds = array<i64: 512, 32>}, {pipeline_mode = #tpu.pipeline_mode<synchronous>, transform_indices = @transform_1, window_bounds = array<i64: 32, 32>}, {pipeline_mode = #tpu.pipeline_mode<synchronous>, transform_indices = @transform_2, window_bounds = array<i64: 32, 4>}, {transform_indices = @transform_3, window_bounds = array<i64: 512, 32>}, {transform_indices = @transform_4, window_bounds = array<i64: 512, 4>}]} {
    %c0 = arith.constant 0 : index
    %c0_0 = arith.constant 0 : index
    %0 = vector.load %arg1[%c0, %c0_0] : memref<512x32xbf16, #tpu.memory_space<vmem>>, vector<512x32xbf16>
    %c0_1 = arith.constant 0 : index
    %c0_2 = arith.constant 0 : index
    %1 = vector.load %arg2[%c0_1, %c0_2] : memref<32x32xbf16, #tpu.memory_space<vmem>>, vector<32x32xbf16>
    %cst = arith.constant dense<0.000000e+00> : vector<512x32xf32>
    %2 = tpu.matmul %0, %1, %cst {dimension_numbers = #tpu.dot_dimension_numbers<[1], [0], [0], [1], [0, 0, 1, 1], [], []>} : vector<512x32xbf16>, vector<32x32xbf16>, vector<512x32xf32> -> vector<512x32xf32>
    %3 = arith.truncf %2 : vector<512x32xf32> to vector<512x32xbf16>
    %c0_3 = arith.constant 0 : index
    %c0_4 = arith.constant 0 : index
    %4 = vector.load %arg4[%c0_3, %c0_4] : memref<512x32xbf16, #tpu.memory_space<vmem>>, vector<512x32xbf16>
    tpu.vector_store %arg4[%c0_3, %c0_4], %3 {strides = array<i32>} : memref<512x32xbf16, #tpu.memory_space<vmem>>, vector<512x32xbf16>,
    %c0_5 = arith.constant 0 : index
    %c0_6 = arith.constant 0 : index
    %5 = vector.load %arg3[%c0_5, %c0_6] : memref<32x4xf32, #tpu.memory_space<vmem>>, vector<32x4xf32>
    %cst_7 = arith.constant dense<0.000000e+00> : vector<512x4xf32>
    %6 = tpu.matmul %2, %5, %cst_7 {dimension_numbers = #tpu.dot_dimension_numbers<[1], [0], [0], [1], [0, 0, 1, 1], [], []>} : vector<512x32xf32>, vector<32x4xf32>, vector<512x4xf32> -> vector<512x4xf32>
    %c0_8 = arith.constant 0 : index
    %c0_9 = arith.constant 0 : index
    %7 = vector.load %arg5[%c0_8, %c0_9] : memref<512x4xf32, #tpu.memory_space<vmem>>, vector<512x4xf32>
    tpu.vector_store %arg5[%c0_8, %c0_9], %6 {strides = array<i32>} : memref<512x4xf32, #tpu.memory_space<vmem>>, vector<512x4xf32>,
    return
  }
  func.func @transform_0(%arg0: i32) -> (i32, i32) {
    %c0_i32 = arith.constant 0 : i32
    %c0_i32_0 = arith.constant 0 : i32
    return %arg0, %c0_i32 : i32, i32
  }
  func.func @transform_1(%arg0: i32) -> (i32, i32) {
    %c0_i32 = arith.constant 0 : i32
    %c0_i32_0 = arith.constant 0 : i32
    %c0_i32_1 = arith.constant 0 : i32
    return %c0_i32, %c0_i32_0 : i32, i32
  }
  func.func @transform_2(%arg0: i32) -> (i32, i32) {
    %c0_i32 = arith.constant 0 : i32
    %c0_i32_0 = arith.constant 0 : i32
    %c0_i32_1 = arith.constant 0 : i32
    return %c0_i32, %c0_i32_0 : i32, i32
  }
  func.func @transform_3(%arg0: i32) -> (i32, i32) {
    %c0_i32 = arith.constant 0 : i32
    %c0_i32_0 = arith.constant 0 : i32
    return %arg0, %c0_i32 : i32, i32
  }
  func.func @transform_4(%arg0: i32) -> (i32, i32) {
    %c0_i32 = arith.constant 0 : i32
    %c0_i32_0 = arith.constant 0 : i32
    return %arg0, %c0_i32 : i32, i32
  }
}

</mosaic_0001>

<bundles_post_ra>
// kernel: tpu_custom_call.1
= control target key start
LH: loop header
LB: loop body
LE: loop exit
PB: predicated region body
PF: predicated region fallthrough
CT: control target
= control target key end

     0   :  { %vm257_vm0 = vcmask 261120   ;;  %vm899_vm1 = vcmask 257024   ;;  %vm1545_vm2 = vcmask 31744   ;;  %s2939_s1 = inlined_call_operand.vmem [shape: bf16[32,32], index: 1, kind: input, shape index: {}]   ;;  %s2940_s0 = inlined_call_operand.vmem [shape: bf16[512,32], index: 0, kind: input, shape index: {}]   ;;  %s2941_s2 = inlined_call_operand.vmem [shape: f32[32,4], index: 2, kind: input, shape index: {}]   ;;  %s2942_s3 = inlined_call_operand.vmem [shape: bf16[512,32], index: 3, kind: output, shape index: {0}]   ;;  %s2943_s4 = inlined_call_operand.vmem [shape: f32[512,4], index: 4, kind: output, shape index: {1}]  }
   0x1   :  { %v2158_v0 = vld [vmem:[%s2939_s1] sm:$0xff]   ;;  %v2159_v1 = vld [vmem:[%s2939_s1 + $0x8] sm:$0xff]   ;;  %v2162_v4 = vld [vmem:[%s2940_s0 + $0x10] sm:$0xff]  }
   0x2   :  { %1978 = vmatprep.subr.bf16.mxu0 %v2158_v0  ;;  %v2160_v2 = vld [vmem:[%s2940_s0] sm:$0xff]   ;;  %v2161_v3 = vld [vmem:[%s2940_s0 + $0x8] sm:$0xff]   ;;  %v2163_v5 = vld [vmem:[%s2940_s0 + $0x18] sm:$0xff]  }
   0x3   :  { %1979 = vmatpush3.bf16.msra.mxu0 %v2158_v0  ;;  %1982 = vmatprep.mubr.msk.bf16.mxu0 %vm257_vm0, %v2160_v2  ;;  %v2164_v6 = vld [vmem:[%s2940_s0 + $0x20] sm:$0xff]   ;;  %v2165_v7 = vld [vmem:[%s2940_s0 + $0x28] sm:$0xff]   ;;  %v2166_v8 = vld [vmem:[%s2940_s0 + $0x30] sm:$0xff]  }
   0x4   :  { %1980 = vmatprep.subr.bf16.mxu0 %v2159_v1  ;;  %v2167_v9 = vld [vmem:[%s2940_s0 + $0x38] sm:$0xff]   ;;  %v2168_v10 = vld [vmem:[%s2940_s0 + $0x40] sm:$0xff]   ;;  %v965_v12 = vld [vmem:[%s2941_s2 + $0x8] sm:$0xff] }
   0x5   :  { %v964_v11 = vld [vmem:[%s2941_s2] sm:$0xff]  ;;  %v2169_v14 = vld [vmem:[%s2940_s0 + $0x48] sm:$0xff]   ;;  %v2170_v15 = vld [vmem:[%s2940_s0 + $0x50] sm:$0xff]  }
   0x6   :  { %v2150_v13 = vpack.c.bf16 %v965_v12, %v964_v11  ;;  %v2171_v16 = vld [vmem:[%s2940_s0 + $0x58] sm:$0xff]   ;;  %v2172_v17 = vld [vmem:[%s2940_s0 + $0x60] sm:$0xff]   ;;  %v2173_v18 = vld [vmem:[%s2940_s0 + $0x68] sm:$0xff]  }
   0x7   :  { %1981 = vmatpush3.bf16.msra.mxu0 %v2159_v1  ;;  %v2174_v19 = vld [vmem:[%s2940_s0 + $0x70] sm:$0xff]   ;;  %v2175_v20 = vld [vmem:[%s2940_s0 + $0x78] sm:$0xff]   ;;  %v2176_v21 = vld [vmem:[%s2940_s0 + $0x80] sm:$0xff]  }
   0x8   :  { %2151 = vmatprep.subr.bf16.mxu1 %v2150_v13  ;;  %v2177_v22 = vld [vmem:[%s2940_s0 + $0x88] sm:$0xff]   ;;  %v2178_v23 = vld [vmem:[%s2940_s0 + $0x90] sm:$0xff]   ;;  %v2179_v24 = vld [vmem:[%s2940_s0 + $0x98] sm:$0xff]  }
   0x9   :  { %2153 = vmatpush3.bf16.msra.mxu1 %v2150_v13  ;;  %v2180_v25 = vld [vmem:[%s2940_s0 + $0xa0] sm:$0xff]   ;;  %v2181_v26 = vld [vmem:[%s2940_s0 + $0xa8] sm:$0xff]   ;;  %v2182_v27 = vld [vmem:[%s2940_s0 + $0xb0] sm:$0xff]  }
   0xa   :  { %1983 = vmatmul.mubr.msk.bf16.vlgmr.msra.gmra.mrb[0].mxu0 %vm257_vm0, %v2161_v3  ;;  %v966_v28 = vld [vmem:[%s2941_s2 + $0x10] sm:$0xff]  ;;  %v967_v29 = vld [vmem:[%s2941_s2 + $0x18] sm:$0xff]  ;;  %v2184_v32 = vld [vmem:[%s2940_s0 + $0xc0] sm:$0xff]  }
   0xb   :  { %1986 = vmatprep.mubr.msk.bf16.mxu0 %vm257_vm0, %v2162_v4  ;;  %v2154_v30 = vpack.c.bf16 %v967_v29, %v966_v28  ;;  %v2183_v31 = vld [vmem:[%s2940_s0 + $0xb8] sm:$0xff]   ;;  %v2185_v33 = vld [vmem:[%s2940_s0 + $0xc8] sm:$0xff]   ;;  %v2186_v34 = vld [vmem:[%s2940_s0 + $0xd0] sm:$0xff]  }
   0xc   :  { %v2187_v35 = vld [vmem:[%s2940_s0 + $0xd8] sm:$0xff]   ;;  %v2188_v36 = vld [vmem:[%s2940_s0 + $0xe0] sm:$0xff]   ;;  %v2189_v37 = vld [vmem:[%s2940_s0 + $0xe8] sm:$0xff]  }
   0xd   :  { %2155 = vmatprep.subr.bf16.mxu1 %v2154_v30  ;;  %v2190_v38 = vld [vmem:[%s2940_s0 + $0xf0] sm:$0xff]   ;;  %v2191_v39 = vld [vmem:[%s2940_s0 + $0xf8] sm:$0xff]  }
   0xe   :  { %2157 = vmatpush3.bf16.msra.mxu1 %v2154_v30 }
  0x12   :  { %1987 = vmatmul.mubr.msk.bf16.gmra.mrb[4].mxu0 %vm257_vm0, %v2163_v5 }
  0x13   :  { %1990 = vmatprep.mubr.msk.bf16.mxu0 %vm257_vm0, %v2164_v6 }
  0x1a   :  { %1991 = vmatmul.mubr.msk.bf16.gmra.mrb[8].mxu0 %vm257_vm0, %v2165_v7 }
  0x1b   :  { %1994 = vmatprep.mubr.msk.bf16.mxu0 %vm257_vm0, %v2166_v8 }
  0x22   :  { %1995 = vmatmul.mubr.msk.bf16.gmra.mrb[12].mxu0 %vm257_vm0, %v2167_v9 }
  0x23   :  { %1998 = vmatprep.mubr.msk.bf16.mxu0 %vm257_vm0, %v2168_v10 }
  0x2a   :  { %1999 = vmatmul.mubr.msk.bf16.gmra.mrb[16].mxu0 %vm257_vm0, %v2169_v14 }
  0x2b   :  { %2002 = vmatprep.mubr.msk.bf16.mxu0 %vm257_vm0, %v2170_v15 }
  0x32   :  { %2003 = vmatmul.mubr.msk.bf16.gmra.mrb[20].mxu0 %vm257_vm0, %v2171_v16 }
  0x33   :  { %2006 = vmatprep.mubr.msk.bf16.mxu0 %vm257_vm0, %v2172_v17 }
  0x3a   :  { %2007 = vmatmul.mubr.msk.bf16.gmra.mrb[24].mxu0 %vm257_vm0, %v2173_v18 }
  0x3b   :  { %2010 = vmatprep.mubr.msk.bf16.mxu0 %vm257_vm0, %v2174_v19 }
  0x42   :  { %2011 = vmatmul.mubr.msk.bf16.gmra.mrb[28].mxu0 %vm257_vm0, %v2175_v20 }
  0x43   :  { %2014 = vmatprep.mubr.msk.bf16.mxu0 %vm257_vm0, %v2176_v21 }
  0x4a   :  { %2015 = vmatmul.mubr.msk.bf16.gmra.mrb[32].mxu0 %vm257_vm0, %v2177_v22 }
  0x4b   :  { %2018 = vmatprep.mubr.msk.bf16.mxu0 %vm257_vm0, %v2178_v23 }
  0x52   :  { %2019 = vmatmul.mubr.msk.bf16.gmra.mrb[36].mxu0 %vm257_vm0, %v2179_v24 }
  0x53   :  { %2022 = vmatprep.mubr.msk.bf16.mxu0 %vm257_vm0, %v2180_v25 }
  0x5a   :  { %2023 = vmatmul.mubr.msk.bf16.gmra.mrb[40].mxu0 %vm257_vm0, %v2181_v26 }
  0x5b   :  { %2026 = vmatprep.mubr.msk.bf16.mxu0 %vm257_vm0, %v2182_v27 }
  0x62   :  { %2027 = vmatmul.mubr.msk.bf16.gmra.mrb[44].mxu0 %vm257_vm0, %v2183_v31 }
  0x63   :  { %2030 = vmatprep.mubr.msk.bf16.mxu0 %vm257_vm0, %v2184_v32 }
  0x6a   :  { %2031 = vmatmul.mubr.msk.bf16.gmra.mrb[48].mxu0 %vm257_vm0, %v2185_v33 }
  0x6b   :  { %2034 = vmatprep.mubr.msk.bf16.mxu0 %vm257_vm0, %v2186_v34 }
  0x72   :  { %2035 = vmatmul.mubr.msk.bf16.gmra.mrb[52].mxu0 %vm257_vm0, %v2187_v35 }
  0x73   :  { %2038 = vmatprep.mubr.msk.bf16.mxu0 %vm257_vm0, %v2188_v36 }
  0x7a   :  { %2039 = vmatmul.mubr.msk.bf16.gmra.mrb[56].mxu0 %vm257_vm0, %v2189_v37 }
  0x7b   :  { %2042 = vmatprep.mubr.msk.bf16.mxu0 %vm257_vm0, %v2190_v38 }
  0x82   :  { %2043 = vmatmul.mubr.msk.bf16.gmra.mrb[60].mxu0 %vm257_vm0, %v2191_v39 }
  0xdd   :  { %v1984_v40 = vpop.f32.mrb[0].mxu0 }
  0xde   :  { %v1814_v41 = vpack.c.bf16 %v1984_v40, %v1984_v40  ;;  %v388_v42 = vpop.f32.mrb[1].mxu0 }
  0xdf   :  { %v1812_v43 = vpack.c.bf16 %v388_v42, %v388_v42  ;;  %v1985_v44 = vpop.f32.mrb[2].mxu0  ;;  %2054 = vmatprep.mubr.msk.f32.mxu1 %vm257_vm0, %v388_v42 }
  0xe0   :  { %902 = vst.msk [vmem:[%s2942_s3 + $0x8] sm:$0xf] %vm899_vm1, %v1814_v41  ;;  %v1815_v45 = vpack.c.bf16 %v1985_v44, %v1985_v44  ;;  %v391_v46 = vpop.f32.mrb[3].mxu0 }
  0xe1   :  { %900 = vst.msk [vmem:[%s2942_s3] sm:$0xf] %vm899_vm1, %v1812_v43  ;;  %v1813_v47 = vpack.c.bf16 %v391_v46, %v391_v46  ;;  %2055 = vmatmul.mubr.msk.f32.vlgmr.msra.gmra.mrb[0].mxu1 %vm257_vm0, %v391_v46 }
  0xe2   :  { %903 = vst.msk [vmem:[%s2942_s3 + $0xc] sm:$0xf] %vm899_vm1, %v1815_v45  ;;  %2057 = vmatprep.mubr.msk.f32.mxu1 %vm257_vm0, %v1984_v40 }
  0xe3   :  { %901 = vst.msk [vmem:[%s2942_s3 + $0x4] sm:$0xf] %vm899_vm1, %v1813_v47 }
  0xe5   :  { %v1988_v48 = vpop.f32.mrb[4].mxu0  ;;  %2058 = vmatmul.mubr.msk.f32.gmra.mrb[2].mxu1 %vm257_vm0, %v1985_v44 }
  0xe6   :  { %v1818_v49 = vpack.c.bf16 %v1988_v48, %v1988_v48  ;;  %v404_v50 = vpop.f32.mrb[5].mxu0 }
  0xe7   :  { %v1816_v51 = vpack.c.bf16 %v404_v50, %v404_v50  ;;  %v1989_v52 = vpop.f32.mrb[6].mxu0  ;;  %2060 = vmatprep.mubr.msk.f32.mxu1 %vm257_vm0, %v404_v50 }
  0xe8   :  { %906 = vst.msk [vmem:[%s2942_s3 + $0x18] sm:$0xf] %vm899_vm1, %v1818_v49  ;;  %v1819_v53 = vpack.c.bf16 %v1989_v52, %v1989_v52  ;;  %v407_v54 = vpop.f32.mrb[7].mxu0 }
  0xe9   :  { %904 = vst.msk [vmem:[%s2942_s3 + $0x10] sm:$0xf] %vm899_vm1, %v1816_v51  ;;  %v1817_v55 = vpack.c.bf16 %v407_v54, %v407_v54  ;;  %2061 = vmatmul.mubr.msk.f32.gmra.mrb[4].mxu1 %vm257_vm0, %v407_v54 }
  0xea   :  { %907 = vst.msk [vmem:[%s2942_s3 + $0x1c] sm:$0xf] %vm899_vm1, %v1819_v53  ;;  %2063 = vmatprep.mubr.msk.f32.mxu1 %vm257_vm0, %v1988_v48 }
  0xeb   :  { %905 = vst.msk [vmem:[%s2942_s3 + $0x14] sm:$0xf] %vm899_vm1, %v1817_v55 }
  0xed   :  { %v1992_v56 = vpop.f32.mrb[8].mxu0  ;;  %2064 = vmatmul.mubr.msk.f32.gmra.mrb[6].mxu1 %vm257_vm0, %v1989_v52 }
  0xee   :  { %v1822_v57 = vpack.c.bf16 %v1992_v56, %v1992_v56  ;;  %v420_v58 = vpop.f32.mrb[9].mxu0 }
  0xef   :  { %v1820_v59 = vpack.c.bf16 %v420_v58, %v420_v58  ;;  %v1993_v60 = vpop.f32.mrb[10].mxu0  ;;  %2066 = vmatprep.mubr.msk.f32.mxu1 %vm257_vm0, %v420_v58 }
  0xf0   :  { %910 = vst.msk [vmem:[%s2942_s3 + $0x28] sm:$0xf] %vm899_vm1, %v1822_v57  ;;  %v1823_v61 = vpack.c.bf16 %v1993_v60, %v1993_v60  ;;  %v423_v62 = vpop.f32.mrb[11].mxu0 }
  0xf1   :  { %908 = vst.msk [vmem:[%s2942_s3 + $0x20] sm:$0xf] %vm899_vm1, %v1820_v59  ;;  %v1821_v63 = vpack.c.bf16 %v423_v62, %v423_v62  ;;  %2067 = vmatmul.mubr.msk.f32.gmra.mrb[8].mxu1 %vm257_vm0, %v423_v62 }
  0xf2   :  { %911 = vst.msk [vmem:[%s2942_s3 + $0x2c] sm:$0xf] %vm899_vm1, %v1823_v61  ;;  %2069 = vmatprep.mubr.msk.f32.mxu1 %vm257_vm0, %v1992_v56 }
  0xf3   :  { %909 = vst.msk [vmem:[%s2942_s3 + $0x24] sm:$0xf] %vm899_vm1, %v1821_v63 }
  0xf5   :  { %v1996_v0 = vpop.f32.mrb[12].mxu0  ;;  %2070 = vmatmul.mubr.msk.f32.gmra.mrb[10].mxu1 %vm257_vm0, %v1993_v60 }
  0xf6   :  { %v1826_v1 = vpack.c.bf16 %v1996_v0, %v1996_v0  ;;  %v436_v2 = vpop.f32.mrb[13].mxu0 }
  0xf7   :  { %v1824_v3 = vpack.c.bf16 %v436_v2, %v436_v2  ;;  %v1997_v4 = vpop.f32.mrb[14].mxu0  ;;  %2072 = vmatprep.mubr.msk.f32.mxu1 %vm257_vm0, %v436_v2 }
  0xf8   :  { %914 = vst.msk [vmem:[%s2942_s3 + $0x38] sm:$0xf] %vm899_vm1, %v1826_v1  ;;  %v1827_v5 = vpack.c.bf16 %v1997_v4, %v1997_v4  ;;  %v439_v6 = vpop.f32.mrb[15].mxu0 }
  0xf9   :  { %912 = vst.msk [vmem:[%s2942_s3 + $0x30] sm:$0xf] %vm899_vm1, %v1824_v3  ;;  %v1825_v7 = vpack.c.bf16 %v439_v6, %v439_v6  ;;  %2073 = vmatmul.mubr.msk.f32.gmra.mrb[12].mxu1 %vm257_vm0, %v439_v6 }
  0xfa   :  { %915 = vst.msk [vmem:[%s2942_s3 + $0x3c] sm:$0xf] %vm899_vm1, %v1827_v5  ;;  %2075 = vmatprep.mubr.msk.f32.mxu1 %vm257_vm0, %v1996_v0 }
  0xfb   :  { %913 = vst.msk [vmem:[%s2942_s3 + $0x34] sm:$0xf] %vm899_vm1, %v1825_v7 }
  0xfd   :  { %v2000_v8 = vpop.f32.mrb[16].mxu0  ;;  %2076 = vmatmul.mubr.msk.f32.gmra.mrb[14].mxu1 %vm257_vm0, %v1997_v4 }
  0xfe   :  { %v1830_v9 = vpack.c.bf16 %v2000_v8, %v2000_v8  ;;  %v452_v10 = vpop.f32.mrb[17].mxu0 }
  0xff   :  { %v1828_v11 = vpack.c.bf16 %v452_v10, %v452_v10  ;;  %v2001_v12 = vpop.f32.mrb[18].mxu0  ;;  %2078 = vmatprep.mubr.msk.f32.mxu1 %vm257_vm0, %v452_v10 }
 0x100   :  { %918 = vst.msk [vmem:[%s2942_s3 + $0x48] sm:$0xf] %vm899_vm1, %v1830_v9  ;;  %v1831_v13 = vpack.c.bf16 %v2001_v12, %v2001_v12  ;;  %v455_v14 = vpop.f32.mrb[19].mxu0 }
 0x101   :  { %916 = vst.msk [vmem:[%s2942_s3 + $0x40] sm:$0xf] %vm899_vm1, %v1828_v11  ;;  %v1829_v15 = vpack.c.bf16 %v455_v14, %v455_v14  ;;  %2079 = vmatmul.mubr.msk.f32.gmra.mrb[16].mxu1 %vm257_vm0, %v455_v14 }
 0x102   :  { %919 = vst.msk [vmem:[%s2942_s3 + $0x4c] sm:$0xf] %vm899_vm1, %v1831_v13  ;;  %2081 = vmatprep.mubr.msk.f32.mxu1 %vm257_vm0, %v2000_v8 }
 0x103   :  { %917 = vst.msk [vmem:[%s2942_s3 + $0x44] sm:$0xf] %vm899_vm1, %v1829_v15 }
 0x105   :  { %v2004_v16 = vpop.f32.mrb[20].mxu0  ;;  %2082 = vmatmul.mubr.msk.f32.gmra.mrb[18].mxu1 %vm257_vm0, %v2001_v12 }
 0x106   :  { %v1834_v17 = vpack.c.bf16 %v2004_v16, %v2004_v16  ;;  %v468_v18 = vpop.f32.mrb[21].mxu0 }
 0x107   :  { %v1832_v19 = vpack.c.bf16 %v468_v18, %v468_v18  ;;  %v2005_v20 = vpop.f32.mrb[22].mxu0  ;;  %2084 = vmatprep.mubr.msk.f32.mxu1 %vm257_vm0, %v468_v18 }
 0x108   :  { %922 = vst.msk [vmem:[%s2942_s3 + $0x58] sm:$0xf] %vm899_vm1, %v1834_v17  ;;  %v1835_v21 = vpack.c.bf16 %v2005_v20, %v2005_v20  ;;  %v471_v22 = vpop.f32.mrb[23].mxu0 }
 0x109   :  { %920 = vst.msk [vmem:[%s2942_s3 + $0x50] sm:$0xf] %vm899_vm1, %v1832_v19  ;;  %v1833_v23 = vpack.c.bf16 %v471_v22, %v471_v22  ;;  %2085 = vmatmul.mubr.msk.f32.gmra.mrb[20].mxu1 %vm257_vm0, %v471_v22 }
 0x10a   :  { %923 = vst.msk [vmem:[%s2942_s3 + $0x5c] sm:$0xf] %vm899_vm1, %v1835_v21  ;;  %2087 = vmatprep.mubr.msk.f32.mxu1 %vm257_vm0, %v2004_v16 }
 0x10b   :  { %921 = vst.msk [vmem:[%s2942_s3 + $0x54] sm:$0xf] %vm899_vm1, %v1833_v23 }
 0x10d   :  { %v2008_v24 = vpop.f32.mrb[24].mxu0  ;;  %2088 = vmatmul.mubr.msk.f32.gmra.mrb[22].mxu1 %vm257_vm0, %v2005_v20 }
 0x10e   :  { %v1838_v25 = vpack.c.bf16 %v2008_v24, %v2008_v24  ;;  %v484_v26 = vpop.f32.mrb[25].mxu0 }
 0x10f   :  { %v1836_v27 = vpack.c.bf16 %v484_v26, %v484_v26  ;;  %v2009_v28 = vpop.f32.mrb[26].mxu0  ;;  %2090 = vmatprep.mubr.msk.f32.mxu1 %vm257_vm0, %v484_v26 }
 0x110   :  { %926 = vst.msk [vmem:[%s2942_s3 + $0x68] sm:$0xf] %vm899_vm1, %v1838_v25  ;;  %v1839_v29 = vpack.c.bf16 %v2009_v28, %v2009_v28  ;;  %v487_v30 = vpop.f32.mrb[27].mxu0 }
 0x111   :  { %924 = vst.msk [vmem:[%s2942_s3 + $0x60] sm:$0xf] %vm899_vm1, %v1836_v27  ;;  %v1837_v31 = vpack.c.bf16 %v487_v30, %v487_v30  ;;  %2091 = vmatmul.mubr.msk.f32.gmra.mrb[24].mxu1 %vm257_vm0, %v487_v30 }
 0x112   :  { %927 = vst.msk [vmem:[%s2942_s3 + $0x6c] sm:$0xf] %vm899_vm1, %v1839_v29  ;;  %2093 = vmatprep.mubr.msk.f32.mxu1 %vm257_vm0, %v2008_v24 }
 0x113   :  { %925 = vst.msk [vmem:[%s2942_s3 + $0x64] sm:$0xf] %vm899_vm1, %v1837_v31 }
 0x115   :  { %v2012_v32 = vpop.f32.mrb[28].mxu0  ;;  %2094 = vmatmul.mubr.msk.f32.gmra.mrb[26].mxu1 %vm257_vm0, %v2009_v28 }
 0x116   :  { %v1842_v33 = vpack.c.bf16 %v2012_v32, %v2012_v32  ;;  %v500_v34 = vpop.f32.mrb[29].mxu0 }
 0x117   :  { %v1840_v35 = vpack.c.bf16 %v500_v34, %v500_v34  ;;  %v2013_v36 = vpop.f32.mrb[30].mxu0  ;;  %2096 = vmatprep.mubr.msk.f32.mxu1 %vm257_vm0, %v500_v34 }
 0x118   :  { %930 = vst.msk [vmem:[%s2942_s3 + $0x78] sm:$0xf] %vm899_vm1, %v1842_v33  ;;  %v1843_v37 = vpack.c.bf16 %v2013_v36, %v2013_v36  ;;  %v503_v38 = vpop.f32.mrb[31].mxu0 }
 0x119   :  { %928 = vst.msk [vmem:[%s2942_s3 + $0x70] sm:$0xf] %vm899_vm1, %v1840_v35  ;;  %v1841_v39 = vpack.c.bf16 %v503_v38, %v503_v38  ;;  %2097 = vmatmul.mubr.msk.f32.gmra.mrb[28].mxu1 %vm257_vm0, %v503_v38 }
 0x11a   :  { %931 = vst.msk [vmem:[%s2942_s3 + $0x7c] sm:$0xf] %vm899_vm1, %v1843_v37  ;;  %2099 = vmatprep.mubr.msk.f32.mxu1 %vm257_vm0, %v2012_v32 }
 0x11b   :  { %929 = vst.msk [vmem:[%s2942_s3 + $0x74] sm:$0xf] %vm899_vm1, %v1841_v39 }
 0x11d   :  { %v2016_v40 = vpop.f32.mrb[32].mxu0  ;;  %2100 = vmatmul.mubr.msk.f32.gmra.mrb[30].mxu1 %vm257_vm0, %v2013_v36 }
 0x11e   :  { %v1846_v41 = vpack.c.bf16 %v2016_v40, %v2016_v40  ;;  %v516_v42 = vpop.f32.mrb[33].mxu0 }
 0x11f   :  { %v1844_v43 = vpack.c.bf16 %v516_v42, %v516_v42  ;;  %v2017_v44 = vpop.f32.mrb[34].mxu0  ;;  %2102 = vmatprep.mubr.msk.f32.mxu1 %vm257_vm0, %v516_v42 }
 0x120   :  { %934 = vst.msk [vmem:[%s2942_s3 + $0x88] sm:$0xf] %vm899_vm1, %v1846_v41  ;;  %v1847_v45 = vpack.c.bf16 %v2017_v44, %v2017_v44  ;;  %v519_v46 = vpop.f32.mrb[35].mxu0 }
 0x121   :  { %932 = vst.msk [vmem:[%s2942_s3 + $0x80] sm:$0xf] %vm899_vm1, %v1844_v43  ;;  %v1845_v47 = vpack.c.bf16 %v519_v46, %v519_v46  ;;  %2103 = vmatmul.mubr.msk.f32.gmra.mrb[32].mxu1 %vm257_vm0, %v519_v46 }
 0x122   :  { %935 = vst.msk [vmem:[%s2942_s3 + $0x8c] sm:$0xf] %vm899_vm1, %v1847_v45  ;;  %2105 = vmatprep.mubr.msk.f32.mxu1 %vm257_vm0, %v2016_v40 }
 0x123   :  { %933 = vst.msk [vmem:[%s2942_s3 + $0x84] sm:$0xf] %vm899_vm1, %v1845_v47 }
 0x125   :  { %v2020_v48 = vpop.f32.mrb[36].mxu0  ;;  %2106 = vmatmul.mubr.msk.f32.gmra.mrb[34].mxu1 %vm257_vm0, %v2017_v44 }
 0x126   :  { %v1850_v49 = vpack.c.bf16 %v2020_v48, %v2020_v48  ;;  %v532_v50 = vpop.f32.mrb[37].mxu0 }
 0x127   :  { %v1848_v51 = vpack.c.bf16 %v532_v50, %v532_v50  ;;  %v2021_v52 = vpop.f32.mrb[38].mxu0  ;;  %2108 = vmatprep.mubr.msk.f32.mxu1 %vm257_vm0, %v532_v50 }
 0x128   :  { %938 = vst.msk [vmem:[%s2942_s3 + $0x98] sm:$0xf] %vm899_vm1, %v1850_v49  ;;  %v1851_v53 = vpack.c.bf16 %v2021_v52, %v2021_v52  ;;  %v535_v54 = vpop.f32.mrb[39].mxu0 }
 0x129   :  { %936 = vst.msk [vmem:[%s2942_s3 + $0x90] sm:$0xf] %vm899_vm1, %v1848_v51  ;;  %v1849_v55 = vpack.c.bf16 %v535_v54, %v535_v54  ;;  %2109 = vmatmul.mubr.msk.f32.gmra.mrb[36].mxu1 %vm257_vm0, %v535_v54 }
 0x12a   :  { %939 = vst.msk [vmem:[%s2942_s3 + $0x9c] sm:$0xf] %vm899_vm1, %v1851_v53  ;;  %2111 = vmatprep.mubr.msk.f32.mxu1 %vm257_vm0, %v2020_v48 }
 0x12b   :  { %937 = vst.msk [vmem:[%s2942_s3 + $0x94] sm:$0xf] %vm899_vm1, %v1849_v55 }
 0x12d   :  { %v2024_v56 = vpop.f32.mrb[40].mxu0  ;;  %2112 = vmatmul.mubr.msk.f32.gmra.mrb[38].mxu1 %vm257_vm0, %v2021_v52 }
 0x12e   :  { %v1854_v57 = vpack.c.bf16 %v2024_v56, %v2024_v56  ;;  %v548_v58 = vpop.f32.mrb[41].mxu0 }
 0x12f   :  { %v1852_v59 = vpack.c.bf16 %v548_v58, %v548_v58  ;;  %v2025_v60 = vpop.f32.mrb[42].mxu0  ;;  %2114 = vmatprep.mubr.msk.f32.mxu1 %vm257_vm0, %v548_v58 }
 0x130   :  { %942 = vst.msk [vmem:[%s2942_s3 + $0xa8] sm:$0xf] %vm899_vm1, %v1854_v57  ;;  %v1855_v61 = vpack.c.bf16 %v2025_v60, %v2025_v60  ;;  %v551_v62 = vpop.f32.mrb[43].mxu0 }
 0x131   :  { %940 = vst.msk [vmem:[%s2942_s3 + $0xa0] sm:$0xf] %vm899_vm1, %v1852_v59  ;;  %v1853_v63 = vpack.c.bf16 %v551_v62, %v551_v62  ;;  %2115 = vmatmul.mubr.msk.f32.gmra.mrb[40].mxu1 %vm257_vm0, %v551_v62 }
 0x132   :  { %943 = vst.msk [vmem:[%s2942_s3 + $0xac] sm:$0xf] %vm899_vm1, %v1855_v61  ;;  %2117 = vmatprep.mubr.msk.f32.mxu1 %vm257_vm0, %v2024_v56 }
 0x133   :  { %941 = vst.msk [vmem:[%s2942_s3 + $0xa4] sm:$0xf] %vm899_vm1, %v1853_v63 }
 0x135   :  { %v2028_v0 = vpop.f32.mrb[44].mxu0  ;;  %2118 = vmatmul.mubr.msk.f32.gmra.mrb[42].mxu1 %vm257_vm0, %v2025_v60 }
 0x136   :  { %v1858_v1 = vpack.c.bf16 %v2028_v0, %v2028_v0  ;;  %v564_v2 = vpop.f32.mrb[45].mxu0 }
 0x137   :  { %v1856_v3 = vpack.c.bf16 %v564_v2, %v564_v2  ;;  %v2029_v4 = vpop.f32.mrb[46].mxu0  ;;  %2120 = vmatprep.mubr.msk.f32.mxu1 %vm257_vm0, %v564_v2 }
 0x138   :  { %946 = vst.msk [vmem:[%s2942_s3 + $0xb8] sm:$0xf] %vm899_vm1, %v1858_v1  ;;  %v1859_v5 = vpack.c.bf16 %v2029_v4, %v2029_v4  ;;  %v567_v6 = vpop.f32.mrb[47].mxu0 }
 0x139   :  { %944 = vst.msk [vmem:[%s2942_s3 + $0xb0] sm:$0xf] %vm899_vm1, %v1856_v3  ;;  %v1857_v7 = vpack.c.bf16 %v567_v6, %v567_v6  ;;  %2121 = vmatmul.mubr.msk.f32.gmra.mrb[44].mxu1 %vm257_vm0, %v567_v6 }
 0x13a   :  { %947 = vst.msk [vmem:[%s2942_s3 + $0xbc] sm:$0xf] %vm899_vm1, %v1859_v5  ;;  %2123 = vmatprep.mubr.msk.f32.mxu1 %vm257_vm0, %v2028_v0 }
 0x13b   :  { %945 = vst.msk [vmem:[%s2942_s3 + $0xb4] sm:$0xf] %vm899_vm1, %v1857_v7 }
 0x13d   :  { %v2032_v8 = vpop.f32.mrb[48].mxu0  ;;  %2124 = vmatmul.mubr.msk.f32.gmra.mrb[46].mxu1 %vm257_vm0, %v2029_v4 }
 0x13e   :  { %v1862_v9 = vpack.c.bf16 %v2032_v8, %v2032_v8  ;;  %v580_v10 = vpop.f32.mrb[49].mxu0 }
 0x13f   :  { %v1860_v11 = vpack.c.bf16 %v580_v10, %v580_v10  ;;  %v2033_v12 = vpop.f32.mrb[50].mxu0  ;;  %2126 = vmatprep.mubr.msk.f32.mxu1 %vm257_vm0, %v580_v10 }
 0x140   :  { %950 = vst.msk [vmem:[%s2942_s3 + $0xc8] sm:$0xf] %vm899_vm1, %v1862_v9  ;;  %v1863_v13 = vpack.c.bf16 %v2033_v12, %v2033_v12  ;;  %v583_v14 = vpop.f32.mrb[51].mxu0 }
 0x141   :  { %948 = vst.msk [vmem:[%s2942_s3 + $0xc0] sm:$0xf] %vm899_vm1, %v1860_v11  ;;  %v1861_v15 = vpack.c.bf16 %v583_v14, %v583_v14  ;;  %2127 = vmatmul.mubr.msk.f32.gmra.mrb[48].mxu1 %vm257_vm0, %v583_v14 }
 0x142   :  { %951 = vst.msk [vmem:[%s2942_s3 + $0xcc] sm:$0xf] %vm899_vm1, %v1863_v13  ;;  %2129 = vmatprep.mubr.msk.f32.mxu1 %vm257_vm0, %v2032_v8 }
 0x143   :  { %949 = vst.msk [vmem:[%s2942_s3 + $0xc4] sm:$0xf] %vm899_vm1, %v1861_v15 }
 0x145   :  { %v2036_v16 = vpop.f32.mrb[52].mxu0  ;;  %2130 = vmatmul.mubr.msk.f32.gmra.mrb[50].mxu1 %vm257_vm0, %v2033_v12 }
 0x146   :  { %v1866_v17 = vpack.c.bf16 %v2036_v16, %v2036_v16  ;;  %v596_v18 = vpop.f32.mrb[53].mxu0 }
 0x147   :  { %v1864_v19 = vpack.c.bf16 %v596_v18, %v596_v18  ;;  %v2037_v20 = vpop.f32.mrb[54].mxu0  ;;  %2132 = vmatprep.mubr.msk.f32.mxu1 %vm257_vm0, %v596_v18 }
 0x148   :  { %954 = vst.msk [vmem:[%s2942_s3 + $0xd8] sm:$0xf] %vm899_vm1, %v1866_v17  ;;  %v1867_v21 = vpack.c.bf16 %v2037_v20, %v2037_v20  ;;  %v599_v22 = vpop.f32.mrb[55].mxu0 }
 0x149   :  { %952 = vst.msk [vmem:[%s2942_s3 + $0xd0] sm:$0xf] %vm899_vm1, %v1864_v19  ;;  %v1865_v23 = vpack.c.bf16 %v599_v22, %v599_v22  ;;  %2133 = vmatmul.mubr.msk.f32.gmra.mrb[52].mxu1 %vm257_vm0, %v599_v22 }
 0x14a   :  { %955 = vst.msk [vmem:[%s2942_s3 + $0xdc] sm:$0xf] %vm899_vm1, %v1867_v21  ;;  %2135 = vmatprep.mubr.msk.f32.mxu1 %vm257_vm0, %v2036_v16 }
 0x14b   :  { %953 = vst.msk [vmem:[%s2942_s3 + $0xd4] sm:$0xf] %vm899_vm1, %v1865_v23 }
 0x14d   :  { %v2040_v24 = vpop.f32.mrb[56].mxu0  ;;  %2136 = vmatmul.mubr.msk.f32.gmra.mrb[54].mxu1 %vm257_vm0, %v2037_v20 }
 0x14e   :  { %v1870_v25 = vpack.c.bf16 %v2040_v24, %v2040_v24  ;;  %v612_v26 = vpop.f32.mrb[57].mxu0 }
 0x14f   :  { %v1868_v27 = vpack.c.bf16 %v612_v26, %v612_v26  ;;  %v2041_v28 = vpop.f32.mrb[58].mxu0  ;;  %2138 = vmatprep.mubr.msk.f32.mxu1 %vm257_vm0, %v612_v26 }
 0x150   :  { %958 = vst.msk [vmem:[%s2942_s3 + $0xe8] sm:$0xf] %vm899_vm1, %v1870_v25  ;;  %v1871_v29 = vpack.c.bf16 %v2041_v28, %v2041_v28  ;;  %v615_v30 = vpop.f32.mrb[59].mxu0 }
 0x151   :  { %956 = vst.msk [vmem:[%s2942_s3 + $0xe0] sm:$0xf] %vm899_vm1, %v1868_v27  ;;  %v1869_v31 = vpack.c.bf16 %v615_v30, %v615_v30  ;;  %2139 = vmatmul.mubr.msk.f32.gmra.mrb[56].mxu1 %vm257_vm0, %v615_v30 }
 0x152   :  { %959 = vst.msk [vmem:[%s2942_s3 + $0xec] sm:$0xf] %vm899_vm1, %v1871_v29  ;;  %2141 = vmatprep.mubr.msk.f32.mxu1 %vm257_vm0, %v2040_v24 }
 0x153   :  { %957 = vst.msk [vmem:[%s2942_s3 + $0xe4] sm:$0xf] %vm899_vm1, %v1869_v31 }
 0x155   :  { %v2044_v32 = vpop.f32.mrb[60].mxu0  ;;  %2142 = vmatmul.mubr.msk.f32.gmra.mrb[58].mxu1 %vm257_vm0, %v2041_v28 }
 0x156   :  { %v1874_v33 = vpack.c.bf16 %v2044_v32, %v2044_v32  ;;  %v628_v34 = vpop.f32.mrb[61].mxu0 }
 0x157   :  { %v1872_v35 = vpack.c.bf16 %v628_v34, %v628_v34  ;;  %v2045_v36 = vpop.f32.mrb[62].mxu0  ;;  %2144 = vmatprep.mubr.msk.f32.mxu1 %vm257_vm0, %v628_v34 }
 0x158   :  { %962 = vst.msk [vmem:[%s2942_s3 + $0xf8] sm:$0xf] %vm899_vm1, %v1874_v33  ;;  %v1875_v37 = vpack.c.bf16 %v2045_v36, %v2045_v36  ;;  %v631_v38 = vpop.f32.mrb[63].mxu0 }
 0x159   :  { %960 = vst.msk [vmem:[%s2942_s3 + $0xf0] sm:$0xf] %vm899_vm1, %v1872_v35  ;;  %v1873_v39 = vpack.c.bf16 %v631_v38, %v631_v38  ;;  %2145 = vmatmul.mubr.msk.f32.gmra.mrb[60].mxu1 %vm257_vm0, %v631_v38 }
 0x15a   :  { %963 = vst.msk [vmem:[%s2942_s3 + $0xfc] sm:$0xf] %vm899_vm1, %v1875_v37  ;;  %2147 = vmatprep.mubr.msk.f32.mxu1 %vm257_vm0, %v2044_v32 }
 0x15b   :  { %961 = vst.msk [vmem:[%s2942_s3 + $0xf4] sm:$0xf] %vm899_vm1, %v1873_v39 }
 0x15d   :  { %2148 = vmatmul.mubr.msk.f32.gmra.mrb[62].mxu1 %vm257_vm0, %v2045_v36 }
 0x1b4   :  { %v2056_v40 = vpop.f32.mrb[0].mxu1 }
 0x1b5   :  { %1547 = vst.msk [vmem:[%s2943_s4 + $0x8] sm:$0xff] %vm1545_vm2, %v2056_v40  ;;  %v1226_v41 = vpop.f32.mrb[1].mxu1 }
 0x1b6   :  { %1546 = vst.msk [vmem:[%s2943_s4] sm:$0xff] %vm1545_vm2, %v1226_v41 }
 0x1b8   :  { %v2059_v42 = vpop.f32.mrb[2].mxu1 }
 0x1b9   :  { %1549 = vst.msk [vmem:[%s2943_s4 + $0x18] sm:$0xff] %vm1545_vm2, %v2059_v42  ;;  %v1236_v43 = vpop.f32.mrb[3].mxu1 }
 0x1ba   :  { %1548 = vst.msk [vmem:[%s2943_s4 + $0x10] sm:$0xff] %vm1545_vm2, %v1236_v43 }
 0x1bc   :  { %v2062_v44 = vpop.f32.mrb[4].mxu1 }
 0x1bd   :  { %1551 = vst.msk [vmem:[%s2943_s4 + $0x28] sm:$0xff] %vm1545_vm2, %v2062_v44  ;;  %v1246_v45 = vpop.f32.mrb[5].mxu1 }
 0x1be   :  { %1550 = vst.msk [vmem:[%s2943_s4 + $0x20] sm:$0xff] %vm1545_vm2, %v1246_v45 }
 0x1c0   :  { %v2065_v46 = vpop.f32.mrb[6].mxu1 }
 0x1c1   :  { %1553 = vst.msk [vmem:[%s2943_s4 + $0x38] sm:$0xff] %vm1545_vm2, %v2065_v46  ;;  %v1256_v47 = vpop.f32.mrb[7].mxu1 }
 0x1c2   :  { %1552 = vst.msk [vmem:[%s2943_s4 + $0x30] sm:$0xff] %vm1545_vm2, %v1256_v47 }
 0x1c4   :  { %v2068_v48 = vpop.f32.mrb[8].mxu1 }
 0x1c5   :  { %1555 = vst.msk [vmem:[%s2943_s4 + $0x48] sm:$0xff] %vm1545_vm2, %v2068_v48  ;;  %v1266_v49 = vpop.f32.mrb[9].mxu1 }
 0x1c6   :  { %1554 = vst.msk [vmem:[%s2943_s4 + $0x40] sm:$0xff] %vm1545_vm2, %v1266_v49 }
 0x1c8   :  { %v2071_v50 = vpop.f32.mrb[10].mxu1 }
 0x1c9   :  { %1557 = vst.msk [vmem:[%s2943_s4 + $0x58] sm:$0xff] %vm1545_vm2, %v2071_v50  ;;  %v1276_v51 = vpop.f32.mrb[11].mxu1 }
 0x1ca   :  { %1556 = vst.msk [vmem:[%s2943_s4 + $0x50] sm:$0xff] %vm1545_vm2, %v1276_v51 }
 0x1cc   :  { %v2074_v52 = vpop.f32.mrb[12].mxu1 }
 0x1cd   :  { %1559 = vst.msk [vmem:[%s2943_s4 + $0x68] sm:$0xff] %vm1545_vm2, %v2074_v52  ;;  %v1286_v53 = vpop.f32.mrb[13].mxu1 }
 0x1ce   :  { %1558 = vst.msk [vmem:[%s2943_s4 + $0x60] sm:$0xff] %vm1545_vm2, %v1286_v53 }
 0x1d0   :  { %v2077_v54 = vpop.f32.mrb[14].mxu1 }
 0x1d1   :  { %1561 = vst.msk [vmem:[%s2943_s4 + $0x78] sm:$0xff] %vm1545_vm2, %v2077_v54  ;;  %v1296_v55 = vpop.f32.mrb[15].mxu1 }
 0x1d2   :  { %1560 = vst.msk [vmem:[%s2943_s4 + $0x70] sm:$0xff] %vm1545_vm2, %v1296_v55 }
 0x1d4   :  { %v2080_v56 = vpop.f32.mrb[16].mxu1 }
 0x1d5   :  { %1563 = vst.msk [vmem:[%s2943_s4 + $0x88] sm:$0xff] %vm1545_vm2, %v2080_v56  ;;  %v1306_v57 = vpop.f32.mrb[17].mxu1 }
 0x1d6   :  { %1562 = vst.msk [vmem:[%s2943_s4 + $0x80] sm:$0xff] %vm1545_vm2, %v1306_v57 }
 0x1d8   :  { %v2083_v58 = vpop.f32.mrb[18].mxu1 }
 0x1d9   :  { %1565 = vst.msk [vmem:[%s2943_s4 + $0x98] sm:$0xff] %vm1545_vm2, %v2083_v58  ;;  %v1316_v59 = vpop.f32.mrb[19].mxu1 }
 0x1da   :  { %1564 = vst.msk [vmem:[%s2943_s4 + $0x90] sm:$0xff] %vm1545_vm2, %v1316_v59 }
 0x1dc   :  { %v2086_v60 = vpop.f32.mrb[20].mxu1 }
 0x1dd   :  { %1567 = vst.msk [vmem:[%s2943_s4 + $0xa8] sm:$0xff] %vm1545_vm2, %v2086_v60  ;;  %v1326_v61 = vpop.f32.mrb[21].mxu1 }
 0x1de   :  { %1566 = vst.msk [vmem:[%s2943_s4 + $0xa0] sm:$0xff] %vm1545_vm2, %v1326_v61 }
 0x1e0   :  { %v2089_v62 = vpop.f32.mrb[22].mxu1 }
 0x1e1   :  { %1569 = vst.msk [vmem:[%s2943_s4 + $0xb8] sm:$0xff] %vm1545_vm2, %v2089_v62  ;;  %v1336_v63 = vpop.f32.mrb[23].mxu1 }
 0x1e2   :  { %1568 = vst.msk [vmem:[%s2943_s4 + $0xb0] sm:$0xff] %vm1545_vm2, %v1336_v63 }
 0x1e4   :  { %v2092_v0 = vpop.f32.mrb[24].mxu1 }
 0x1e5   :  { %1571 = vst.msk [vmem:[%s2943_s4 + $0xc8] sm:$0xff] %vm1545_vm2, %v2092_v0  ;;  %v1346_v1 = vpop.f32.mrb[25].mxu1 }
 0x1e6   :  { %1570 = vst.msk [vmem:[%s2943_s4 + $0xc0] sm:$0xff] %vm1545_vm2, %v1346_v1 }
 0x1e8   :  { %v2095_v2 = vpop.f32.mrb[26].mxu1 }
 0x1e9   :  { %1573 = vst.msk [vmem:[%s2943_s4 + $0xd8] sm:$0xff] %vm1545_vm2, %v2095_v2  ;;  %v1356_v3 = vpop.f32.mrb[27].mxu1 }
 0x1ea   :  { %1572 = vst.msk [vmem:[%s2943_s4 + $0xd0] sm:$0xff] %vm1545_vm2, %v1356_v3 }
 0x1ec   :  { %v2098_v4 = vpop.f32.mrb[28].mxu1 }
 0x1ed   :  { %1575 = vst.msk [vmem:[%s2943_s4 + $0xe8] sm:$0xff] %vm1545_vm2, %v2098_v4  ;;  %v1366_v5 = vpop.f32.mrb[29].mxu1 }
 0x1ee   :  { %1574 = vst.msk [vmem:[%s2943_s4 + $0xe0] sm:$0xff] %vm1545_vm2, %v1366_v5 }
 0x1f0   :  { %v2101_v6 = vpop.f32.mrb[30].mxu1 }
 0x1f1   :  { %1577 = vst.msk [vmem:[%s2943_s4 + $0xf8] sm:$0xff] %vm1545_vm2, %v2101_v6  ;;  %v1376_v7 = vpop.f32.mrb[31].mxu1 }
 0x1f2   :  { %1576 = vst.msk [vmem:[%s2943_s4 + $0xf0] sm:$0xff] %vm1545_vm2, %v1376_v7 }
 0x1f4   :  { %v2104_v8 = vpop.f32.mrb[32].mxu1 }
 0x1f5   :  { %1579 = vst.msk [vmem:[%s2943_s4 + $0x108] sm:$0xff] %vm1545_vm2, %v2104_v8  ;;  %v1386_v9 = vpop.f32.mrb[33].mxu1 }
 0x1f6   :  { %1578 = vst.msk [vmem:[%s2943_s4 + $0x100] sm:$0xff] %vm1545_vm2, %v1386_v9 }
 0x1f8   :  { %v2107_v10 = vpop.f32.mrb[34].mxu1 }
 0x1f9   :  { %1581 = vst.msk [vmem:[%s2943_s4 + $0x118] sm:$0xff] %vm1545_vm2, %v2107_v10  ;;  %v1396_v11 = vpop.f32.mrb[35].mxu1 }
 0x1fa   :  { %1580 = vst.msk [vmem:[%s2943_s4 + $0x110] sm:$0xff] %vm1545_vm2, %v1396_v11 }
 0x1fc   :  { %v2110_v12 = vpop.f32.mrb[36].mxu1 }
 0x1fd   :  { %1583 = vst.msk [vmem:[%s2943_s4 + $0x128] sm:$0xff] %vm1545_vm2, %v2110_v12  ;;  %v1406_v13 = vpop.f32.mrb[37].mxu1 }
 0x1fe   :  { %1582 = vst.msk [vmem:[%s2943_s4 + $0x120] sm:$0xff] %vm1545_vm2, %v1406_v13 }
 0x200   :  { %v2113_v14 = vpop.f32.mrb[38].mxu1 }
 0x201   :  { %1585 = vst.msk [vmem:[%s2943_s4 + $0x138] sm:$0xff] %vm1545_vm2, %v2113_v14  ;;  %v1416_v15 = vpop.f32.mrb[39].mxu1 }
 0x202   :  { %1584 = vst.msk [vmem:[%s2943_s4 + $0x130] sm:$0xff] %vm1545_vm2, %v1416_v15 }
 0x204   :  { %v2116_v16 = vpop.f32.mrb[40].mxu1 }
 0x205   :  { %1587 = vst.msk [vmem:[%s2943_s4 + $0x148] sm:$0xff] %vm1545_vm2, %v2116_v16  ;;  %v1426_v17 = vpop.f32.mrb[41].mxu1 }
 0x206   :  { %1586 = vst.msk [vmem:[%s2943_s4 + $0x140] sm:$0xff] %vm1545_vm2, %v1426_v17 }
 0x208   :  { %v2119_v18 = vpop.f32.mrb[42].mxu1 }
 0x209   :  { %1589 = vst.msk [vmem:[%s2943_s4 + $0x158] sm:$0xff] %vm1545_vm2, %v2119_v18  ;;  %v1436_v19 = vpop.f32.mrb[43].mxu1 }
 0x20a   :  { %1588 = vst.msk [vmem:[%s2943_s4 + $0x150] sm:$0xff] %vm1545_vm2, %v1436_v19 }
 0x20c   :  { %v2122_v20 = vpop.f32.mrb[44].mxu1 }
 0x20d   :  { %1591 = vst.msk [vmem:[%s2943_s4 + $0x168] sm:$0xff] %vm1545_vm2, %v2122_v20  ;;  %v1446_v21 = vpop.f32.mrb[45].mxu1 }
 0x20e   :  { %1590 = vst.msk [vmem:[%s2943_s4 + $0x160] sm:$0xff] %vm1545_vm2, %v1446_v21 }
 0x210   :  { %v2125_v22 = vpop.f32.mrb[46].mxu1 }
 0x211   :  { %1593 = vst.msk [vmem:[%s2943_s4 + $0x178] sm:$0xff] %vm1545_vm2, %v2125_v22  ;;  %v1456_v23 = vpop.f32.mrb[47].mxu1 }
 0x212   :  { %1592 = vst.msk [vmem:[%s2943_s4 + $0x170] sm:$0xff] %vm1545_vm2, %v1456_v23 }
 0x214   :  { %v2128_v24 = vpop.f32.mrb[48].mxu1 }
 0x215   :  { %1595 = vst.msk [vmem:[%s2943_s4 + $0x188] sm:$0xff] %vm1545_vm2, %v2128_v24  ;;  %v1466_v25 = vpop.f32.mrb[49].mxu1 }
 0x216   :  { %1594 = vst.msk [vmem:[%s2943_s4 + $0x180] sm:$0xff] %vm1545_vm2, %v1466_v25 }
 0x218   :  { %v2131_v26 = vpop.f32.mrb[50].mxu1 }
 0x219   :  { %1597 = vst.msk [vmem:[%s2943_s4 + $0x198] sm:$0xff] %vm1545_vm2, %v2131_v26  ;;  %v1476_v27 = vpop.f32.mrb[51].mxu1 }
 0x21a   :  { %1596 = vst.msk [vmem:[%s2943_s4 + $0x190] sm:$0xff] %vm1545_vm2, %v1476_v27 }
 0x21c   :  { %v2134_v28 = vpop.f32.mrb[52].mxu1 }
 0x21d   :  { %1599 = vst.msk [vmem:[%s2943_s4 + $0x1a8] sm:$0xff] %vm1545_vm2, %v2134_v28  ;;  %v1486_v29 = vpop.f32.mrb[53].mxu1 }
 0x21e   :  { %1598 = vst.msk [vmem:[%s2943_s4 + $0x1a0] sm:$0xff] %vm1545_vm2, %v1486_v29 }
 0x220   :  { %v2137_v30 = vpop.f32.mrb[54].mxu1 }
 0x221   :  { %1601 = vst.msk [vmem:[%s2943_s4 + $0x1b8] sm:$0xff] %vm1545_vm2, %v2137_v30  ;;  %v1496_v31 = vpop.f32.mrb[55].mxu1 }
 0x222   :  { %1600 = vst.msk [vmem:[%s2943_s4 + $0x1b0] sm:$0xff] %vm1545_vm2, %v1496_v31 }
 0x224   :  { %v2140_v32 = vpop.f32.mrb[56].mxu1 }
 0x225   :  { %1603 = vst.msk [vmem:[%s2943_s4 + $0x1c8] sm:$0xff] %vm1545_vm2, %v2140_v32  ;;  %v1506_v33 = vpop.f32.mrb[57].mxu1 }
 0x226   :  { %1602 = vst.msk [vmem:[%s2943_s4 + $0x1c0] sm:$0xff] %vm1545_vm2, %v1506_v33 }
 0x228   :  { %v2143_v34 = vpop.f32.mrb[58].mxu1 }
 0x229   :  { %1605 = vst.msk [vmem:[%s2943_s4 + $0x1d8] sm:$0xff] %vm1545_vm2, %v2143_v34  ;;  %v1516_v35 = vpop.f32.mrb[59].mxu1 }
 0x22a   :  { %1604 = vst.msk [vmem:[%s2943_s4 + $0x1d0] sm:$0xff] %vm1545_vm2, %v1516_v35 }
 0x22c   :  { %v2146_v36 = vpop.f32.mrb[60].mxu1 }
 0x22d   :  { %1607 = vst.msk [vmem:[%s2943_s4 + $0x1e8] sm:$0xff] %vm1545_vm2, %v2146_v36  ;;  %v1526_v37 = vpop.f32.mrb[61].mxu1 }
 0x22e   :  { %1606 = vst.msk [vmem:[%s2943_s4 + $0x1e0] sm:$0xff] %vm1545_vm2, %v1526_v37 }
 0x230   :  { %v2149_v38 = vpop.f32.mrb[62].mxu1 }
 0x231   :  { %1609 = vst.msk [vmem:[%s2943_s4 + $0x1f8] sm:$0xff] %vm1545_vm2, %v2149_v38  ;;  %v1536_v39 = vpop.f32.mrb[63].mxu1 }
 0x232   :  { %1608 = vst.msk [vmem:[%s2943_s4 + $0x1f0] sm:$0xff] %vm1545_vm2, %v1536_v39 }

</bundles_post_ra>
